<compile_context>
chip_gen: v6e
topology: v6e:2x2x1
jax: 0.10.0
libtpu: 0.0.40
codegen_flags: <defaults>
</compile_context>

<pallas_src>
import jax
import jax.numpy as jnp
from jax.experimental import pallas as pl
from jax.experimental.pallas import tpu as pltpu

IN_FEATURES = 784      # 28 * 28
HIDDEN = 196
HIDDEN_PAD = 256       # 196 padded to 2 x 128 lanes (exact: W2 pad rows are zero)


def _autoencoder_kernel(x_ref, w1_ref, b1_ref, w2_ref, b2_ref, o_ref):
    # x_ref : (TILE_B, 784) f32        w1_ref: (784, 256) bf16   b1_ref: (1, 256) f32
    # w2_ref: (256, 784)    bf16       b2_ref: (1, 784)   f32    o_ref : (TILE_B, 784)
    # In-kernel cast to bf16 (VPU) right before the MXU dot -> no wrapper-side cast traffic.
    x_bf16 = x_ref[...].astype(jnp.bfloat16)
    # encoder: sigmoid(x @ W1 + b1) -- bf16 MXU matmul, f32 accumulation, f32 sigmoid (EUP)
    h = jnp.dot(x_bf16, w1_ref[...], preferred_element_type=jnp.float32) + b1_ref[...]
    h = jax.nn.sigmoid(h)
    # decoder: h @ W2 + b2 (no activation, matches the PyTorch module)
    y = jnp.dot(h.astype(jnp.bfloat16), w2_ref[...],
                preferred_element_type=jnp.float32) + b2_ref[...]
    o_ref[...] = y.astype(o_ref.dtype)


def pack_params(w1, b1, w2, b2):
    """Pad hidden dim 196 -> 256 and cast weights to bf16 ONCE (cache the result).

    w1: (784, 196), b1: (196,)/(1,196), w2: (196, 784), b2: (784,)/(1,784)
    (weights pre-transposed relative to torch.nn.Linear, i.e. stored as (in, out)).
    b1 pad entries are 0 -> sigmoid(0)=0.5, but the matching W2 rows are zero, so
    the padded hidden lanes contribute nothing to the output.
    """
    w1p = jnp.zeros((IN_FEATURES, HIDDEN_PAD), jnp.bfloat16)
    w1p = w1p.at[:, :HIDDEN].set(jnp.asarray(w1, jnp.float32).astype(jnp.bfloat16))
    b1p = jnp.zeros((1, HIDDEN_PAD), jnp.float32)
    b1p = b1p.at[:, :HIDDEN].set(jnp.asarray(b1, jnp.float32).reshape(1, HIDDEN))
    w2p = jnp.zeros((HIDDEN_PAD, IN_FEATURES), jnp.bfloat16)
    w2p = w2p.at[:HIDDEN, :].set(jnp.asarray(w2, jnp.float32).astype(jnp.bfloat16))
    b2p = jnp.asarray(b2, jnp.float32).reshape(1, IN_FEATURES)
    return w1p, b1p, w2p, b2p


def _choose_batch_tile(batch, max_tile):
    """Pick a batch tile: multiple of 8 sublanes, large (amortize per-step overhead),
    but with >=2 grid steps whenever there is enough work (v7x megacore sharding)."""
    b8 = max(8, -(-batch // 8) * 8)          # batch rounded up to a sublane multiple
    tile = min(max_tile, b8)
    if b8 >= 16:                             # ensure at least 2 grid steps
        tile = min(tile, -(-b8 // 2))
    tile = max(8, -(-tile // 8) * 8)         # round up to a multiple of 8
    return tile


def mnist_autoencoder_forward(x_nchw, packed_params, *, tile_b=2048,
                              out_dtype=jnp.float32):
    """x_nchw: (B, 1, 28, 28) float32 -> (B, 1, 28, 28) out_dtype.

    packed_params: output of pack_params() (pad/cast done once, outside this call).
    """
    w1p, b1p, w2p, b2p = packed_params
    B = x_nchw.shape[0]
    x_flat = x_nchw.reshape(B, IN_FEATURES)            # torch: x.view(-1, 784), stays f32

    tile = _choose_batch_tile(B, tile_b)
    b_pad = -(-B // tile) * tile
    if b_pad != B:
        x_flat = jnp.pad(x_flat, ((0, b_pad - B), (0, 0)))
    grid = (b_pad // tile,)

    out_flat = pl.pallas_call(
        _autoencoder_kernel,
        out_shape=jax.ShapeDtypeStruct((b_pad, IN_FEATURES), out_dtype),
        grid_spec=pltpu.PrefetchScalarGridSpec(
            num_scalar_prefetch=0,
            grid=grid,
            in_specs=[
                pl.BlockSpec((tile, IN_FEATURES), lambda i: (i, 0)),          # x tile (streamed, f32)
                pl.BlockSpec((IN_FEATURES, HIDDEN_PAD), lambda i: (0, 0)),    # W1 (VMEM-resident)
                pl.BlockSpec((1, HIDDEN_PAD), lambda i: (0, 0)),              # b1 (resident)
                pl.BlockSpec((HIDDEN_PAD, IN_FEATURES), lambda i: (0, 0)),    # W2 (resident)
                pl.BlockSpec((1, IN_FEATURES), lambda i: (0, 0)),             # b2 (resident)
            ],
            out_specs=pl.BlockSpec((tile, IN_FEATURES), lambda i: (i, 0)),    # out tile (streamed)
        ),
        compiler_params=pltpu.CompilerParams(
            dimension_semantics=("parallel",),     # shard batch tiles across v7x's 2 TCs
            # tile_b=2048: ~27 MiB (double-buffered f32 x/out + bf16 weights);
            # fits 48 MiB on all generations (> v5e's 16 MiB scoped default,
            # comfortably under v7x's 64 MiB physical VMEM).
            vmem_limit_bytes=48 * 1024 * 1024,
        ),
    )(x_flat, w1p, b1p, w2p, b2p)

    return out_flat[:B].reshape(B, 1, 28, 28)          # torch: .view(-1, 1, 28, 28)


def init_params(key):
    """Deterministic init matching torch.nn.Linear default: U(-1/sqrt(fan_in), 1/sqrt(fan_in))."""
    k1, k2, k3, k4 = jax.random.split(key, 4)
    bound1 = 1.0 / jnp.sqrt(784.0)
    bound2 = 1.0 / jnp.sqrt(196.0)
    # Stored transposed vs torch (out,in) -> (in,out) so the kernel does x @ W.
    w1 = jax.random.uniform(k1, (784, 196), jnp.float32, -bound1, bound1)
    b1 = jax.random.uniform(k2, (1, 196), jnp.float32, -bound1, bound1)
    w2 = jax.random.uniform(k3, (196, 784), jnp.float32, -bound2, bound2)
    b2 = jax.random.uniform(k4, (1, 784), jnp.float32, -bound2, bound2)
    return w1, b1, w2, b2


if __name__ == "__main__":
    key = jax.random.PRNGKey(0)
    pkey, xkey = jax.random.split(key)
    w1, b1, w2, b2 = init_params(pkey)

    # Pack (pad + bf16 cast) the weights ONCE, outside the forward hot path.
    packed = jax.block_until_ready(pack_params(w1, b1, w2, b2))

    # small batch of MNIST-shaped inputs, NCHW
    x = jax.random.uniform(xkey, (2, 1, 28, 28), jnp.float32)

    out = mnist_autoencoder_forward(x, packed)
    out = jax.block_until_ready(out)

    # reference check in plain JAX (f32); tolerance relaxed for the bf16 MXU inputs
    ref = jax.nn.sigmoid(x.reshape(2, 784) @ w1 + b1) @ w2 + b2
    ref = ref.reshape(2, 1, 28, 28)
    assert out.shape == (2, 1, 28, 28)
    assert out.dtype == jnp.float32
    assert jnp.allclose(out, ref, atol=2e-2, rtol=2e-2), float(jnp.max(jnp.abs(out - ref)))

    print("KERNEL_OK")
</pallas_src>

<mosaic_0001>
module attributes {stable_mosaic.version = 11 : i64} {
  func.func @_autoencoder_kernel(%arg0: i32, %arg1: memref<8x784xf32, #tpu.memory_space<vmem>>, %arg2: memref<784x256xbf16, #tpu.memory_space<vmem>>, %arg3: memref<1x256xf32, #tpu.memory_space<vmem>>, %arg4: memref<256x784xbf16, #tpu.memory_space<vmem>>, %arg5: memref<1x784xf32, #tpu.memory_space<vmem>>, %arg6: memref<8x784xf32, #tpu.memory_space<vmem>>) attributes {dimension_semantics = [#tpu.dimension_semantics<parallel>], iteration_bounds = array<i64: 1>, scalar_prefetch = 0 : i64, scratch_operands = 0 : i64, tpu.core_type = #tpu.core_type<tc>, window_params = [{transform_indices = @transform_0, window_bounds = array<i64: 8, 784>}, {pipeline_mode = #tpu.pipeline_mode<synchronous>, transform_indices = @transform_1, window_bounds = array<i64: 784, 256>}, {pipeline_mode = #tpu.pipeline_mode<synchronous>, transform_indices = @transform_2, window_bounds = array<i64: 1, 256>}, {pipeline_mode = #tpu.pipeline_mode<synchronous>, transform_indices = @transform_3, window_bounds = array<i64: 256, 784>}, {pipeline_mode = #tpu.pipeline_mode<synchronous>, transform_indices = @transform_4, window_bounds = array<i64: 1, 784>}, {transform_indices = @transform_5, window_bounds = array<i64: 8, 784>}]} {
    %c0 = arith.constant 0 : index
    %c0_0 = arith.constant 0 : index
    %0 = vector.load %arg1[%c0, %c0_0] : memref<8x784xf32, #tpu.memory_space<vmem>>, vector<8x784xf32>
    %1 = arith.truncf %0 : vector<8x784xf32> to vector<8x784xbf16>
    %c0_1 = arith.constant 0 : index
    %c0_2 = arith.constant 0 : index
    %2 = vector.load %arg2[%c0_1, %c0_2] : memref<784x256xbf16, #tpu.memory_space<vmem>>, vector<784x256xbf16>
    %cst = arith.constant dense<0.000000e+00> : vector<8x256xf32>
    %3 = tpu.matmul %1, %2, %cst {dimension_numbers = #tpu.dot_dimension_numbers<[1], [0], [0], [1], [0, 0, 1, 1], [], []>} : vector<8x784xbf16>, vector<784x256xbf16>, vector<8x256xf32> -> vector<8x256xf32>
    %c0_3 = arith.constant 0 : index
    %c0_4 = arith.constant 0 : index
    %4 = vector.load %arg3[%c0_3, %c0_4] : memref<1x256xf32, #tpu.memory_space<vmem>>, vector<1x256xf32>
    %5 = vector.broadcast %4 : vector<1x256xf32> to vector<8x256xf32>
    %6 = arith.addf %3, %5 : vector<8x256xf32>
    %7 = arith.negf %6 : vector<8x256xf32>
    %8 = math.exp %7 : vector<8x256xf32>
    %cst_5 = arith.constant 1.000000e+00 : f32
    %9 = vector.broadcast %cst_5 : f32 to vector<8x256xf32>
    %10 = arith.addf %9, %8 : vector<8x256xf32>
    %11 = arith.divf %9, %10 : vector<8x256xf32>
    %12 = arith.truncf %11 : vector<8x256xf32> to vector<8x256xbf16>
    %c0_6 = arith.constant 0 : index
    %c0_7 = arith.constant 0 : index
    %13 = vector.load %arg4[%c0_6, %c0_7] : memref<256x784xbf16, #tpu.memory_space<vmem>>, vector<256x784xbf16>
    %cst_8 = arith.constant dense<0.000000e+00> : vector<8x784xf32>
    %14 = tpu.matmul %12, %13, %cst_8 {dimension_numbers = #tpu.dot_dimension_numbers<[1], [0], [0], [1], [0, 0, 1, 1], [], []>} : vector<8x256xbf16>, vector<256x784xbf16>, vector<8x784xf32> -> vector<8x784xf32>
    %c0_9 = arith.constant 0 : index
    %c0_10 = arith.constant 0 : index
    %15 = vector.load %arg5[%c0_9, %c0_10] : memref<1x784xf32, #tpu.memory_space<vmem>>, vector<1x784xf32>
    %16 = vector.broadcast %15 : vector<1x784xf32> to vector<8x784xf32>
    %17 = arith.addf %14, %16 : vector<8x784xf32>
    %c0_11 = arith.constant 0 : index
    %c0_12 = arith.constant 0 : index
    %18 = vector.load %arg6[%c0_11, %c0_12] : memref<8x784xf32, #tpu.memory_space<vmem>>, vector<8x784xf32>
    tpu.vector_store %arg6[%c0_11, %c0_12], %17 {strides = array<i32>} : memref<8x784xf32, #tpu.memory_space<vmem>>, vector<8x784xf32>,
    return
  }
  func.func @transform_0(%arg0: i32) -> (i32, i32) {
    %c0_i32 = arith.constant 0 : i32
    %c0_i32_0 = arith.constant 0 : i32
    return %arg0, %c0_i32 : i32, i32
  }
  func.func @transform_1(%arg0: i32) -> (i32, i32) {
    %c0_i32 = arith.constant 0 : i32
    %c0_i32_0 = arith.constant 0 : i32
    %c0_i32_1 = arith.constant 0 : i32
    return %c0_i32, %c0_i32_0 : i32, i32
  }
  func.func @transform_2(%arg0: i32) -> (i32, i32) {
    %c0_i32 = arith.constant 0 : i32
    %c0_i32_0 = arith.constant 0 : i32
    %c0_i32_1 = arith.constant 0 : i32
    return %c0_i32, %c0_i32_0 : i32, i32
  }
  func.func @transform_3(%arg0: i32) -> (i32, i32) {
    %c0_i32 = arith.constant 0 : i32
    %c0_i32_0 = arith.constant 0 : i32
    %c0_i32_1 = arith.constant 0 : i32
    return %c0_i32, %c0_i32_0 : i32, i32
  }
  func.func @transform_4(%arg0: i32) -> (i32, i32) {
    %c0_i32 = arith.constant 0 : i32
    %c0_i32_0 = arith.constant 0 : i32
    %c0_i32_1 = arith.constant 0 : i32
    return %c0_i32, %c0_i32_0 : i32, i32
  }
  func.func @transform_5(%arg0: i32) -> (i32, i32) {
    %c0_i32 = arith.constant 0 : i32
    %c0_i32_0 = arith.constant 0 : i32
    return %arg0, %c0_i32 : i32, i32
  }
}

</mosaic_0001>

<bundles_post_ra>
// kernel: tpu_custom_call.1
= control target key start
LH: loop header
LB: loop body
LE: loop exit
PB: predicated region body
PF: predicated region fallthrough
CT: control target
= control target key end

     0   :  { %vm636_vm0 = vcmask 130048   ;;  %s3034_s0 = inlined_call_operand.vmem [shape: f32[8,784], index: 0, kind: input, shape index: {}]   ;;  %s3035_s1 = inlined_call_operand.vmem [shape: bf16[784,256], index: 1, kind: input, shape index: {}]   ;;  %s3036_s2 = inlined_call_operand.vmem [shape: f32[1,256], index: 2, kind: input, shape index: {}]   ;;  %s3037_s3 = inlined_call_operand.vmem [shape: bf16[256,784], index: 3, kind: input, shape index: {}]   ;;  %s3038_s4 = inlined_call_operand.vmem [shape: f32[1,784], index: 4, kind: input, shape index: {}]   ;;  %s3039_s5 = inlined_call_operand.hbm [shape: f32[8,784], index: 5, kind: output, shape index: {}]  }
   0x1   :  { %v1980_v0 = vld [vmem:[%s3035_s1 + $0x74] ss:$8 sps:$4 sm:$0xff]   ;;  %v1982_v1 = vld [vmem:[%s3035_s1 + $0x70] ss:$8 sps:$4 sm:$0xff]   ;;  %v1986_v4 = vld [vmem:[%s3035_s1 + $0x64] ss:$8 sps:$4 sm:$0xff]  }
   0x2   :  { %640 = vmatprep.subr.bf16.mxu0 %v1980_v0  ;;  %v1983_v2 = vld [vmem:[%s3035_s1 + $0x174] ss:$8 sps:$4 sm:$0xff]   ;;  %v1985_v3 = vld [vmem:[%s3035_s1 + $0x170] ss:$8 sps:$4 sm:$0xff]   ;;  %v1988_v5 = vld [vmem:[%s3035_s1 + $0x60] ss:$8 sps:$4 sm:$0xff]  }
   0x3   :  { %641 = vmatpush1.bf16.msra.mxu0 %v1982_v1  ;;  %681 = vmatprep.subr.bf16.mxu1 %v1983_v2  ;;  %v1989_v6 = vld [vmem:[%s3035_s1 + $0x164] ss:$8 sps:$4 sm:$0xff]   ;;  %v1991_v7 = vld [vmem:[%s3035_s1 + $0x160] ss:$8 sps:$4 sm:$0xff]   ;;  %v1992_v8 = vld [vmem:[%s3035_s1 + $0x54] ss:$8 sps:$4 sm:$0xff]  }
   0x4   :  { %682 = vmatpush1.bf16.msra.mxu1 %v1985_v3  ;;  %642 = vmatprep.subr.bf16.mxu0 %v1986_v4  ;;  %v1994_v9 = vld [vmem:[%s3035_s1 + $0x50] ss:$8 sps:$4 sm:$0xff]   ;;  %v1995_v10 = vld [vmem:[%s3035_s1 + $0x154] ss:$8 sps:$4 sm:$0xff]   ;;  %v1998_v11 = vld [vmem:[%s3035_s1 + $0x44] ss:$8 sps:$4 sm:$0xff]  }
   0x5   :  { %683 = vmatprep.subr.bf16.mxu1 %v1989_v6  ;;  %v1997_v12 = vld [vmem:[%s3035_s1 + $0x150] ss:$8 sps:$4 sm:$0xff]   ;;  %v2001_v13 = vld [vmem:[%s3035_s1 + $0x144] ss:$8 sps:$4 sm:$0xff]   ;;  %v2000_v14 = vld [vmem:[%s3035_s1 + $0x40] ss:$8 sps:$4 sm:$0xff]  }
   0x6   :  { %v2004_v15 = vld [vmem:[%s3035_s1 + $0x34] ss:$8 sps:$4 sm:$0xff]   ;;  %v2003_v16 = vld [vmem:[%s3035_s1 + $0x140] ss:$8 sps:$4 sm:$0xff]   ;;  %v2006_v18 = vld [vmem:[%s3035_s1 + $0x30] ss:$8 sps:$4 sm:$0xff]  }
   0x7   :  { %643 = vmatpush1.bf16.msra.mxu0 %v1988_v5  ;;  %v2007_v17 = vld [vmem:[%s3035_s1 + $0x134] ss:$8 sps:$4 sm:$0xff]   ;;  %v2010_v19 = vld [vmem:[%s3035_s1 + $0x24] ss:$8 sps:$4 sm:$0xff]   ;;  %v2009_v20 = vld [vmem:[%s3035_s1 + $0x130] ss:$8 sps:$4 sm:$0xff]  }
   0x8   :  { %644 = vmatprep.subr.bf16.mxu0 %v1992_v8  ;;  %684 = vmatpush1.bf16.msra.mxu1 %v1991_v7  ;;  %v2013_v21 = vld [vmem:[%s3035_s1 + $0x124] ss:$8 sps:$4 sm:$0xff]   ;;  %v2012_v22 = vld [vmem:[%s3035_s1 + $0x20] ss:$8 sps:$4 sm:$0xff]   ;;  %v2016_v23 = vld [vmem:[%s3035_s1 + $0x14] ss:$8 sps:$4 sm:$0xff]  }
   0x9   :  { %685 = vmatprep.subr.bf16.mxu1 %v1995_v10  ;;  %v2015_v24 = vld [vmem:[%s3035_s1 + $0x120] ss:$8 sps:$4 sm:$0xff]   ;;  %v2019_v25 = vld [vmem:[%s3035_s1 + $0x114] ss:$8 sps:$4 sm:$0xff]   ;;  %v2018_v26 = vld [vmem:[%s3035_s1 + $0x10] ss:$8 sps:$4 sm:$0xff]  }
   0xa   :  { %v2022_v27 = vld [vmem:[%s3035_s1 + $0x4] ss:$8 sps:$4 sm:$0xff]   ;;  %v2021_v28 = vld [vmem:[%s3035_s1 + $0x110] ss:$8 sps:$4 sm:$0xff]   ;;  %v2024_v30 = vld [vmem:[%s3035_s1] ss:$8 sps:$4 sm:$0xff]  }
   0xb   :  { %645 = vmatpush1.bf16.msra.mxu0 %v1994_v9  ;;  %v2025_v29 = vld [vmem:[%s3035_s1 + $0x104] ss:$8 sps:$4 sm:$0xff]   ;;  %v2028_v31 = vld [vmem:[%s3035_s1 + $0xf4] ss:$8 sps:$4 sm:$0xff]   ;;  %v2027_v32 = vld [vmem:[%s3035_s1 + $0x100] ss:$8 sps:$4 sm:$0xff]  }
   0xc   :  { %646 = vmatprep.subr.bf16.mxu0 %v1998_v11  ;;  %686 = vmatpush1.bf16.msra.mxu1 %v1997_v12  ;;  %v2031_v33 = vld [vmem:[%s3035_s1 + $0x1f4] ss:$8 sps:$4 sm:$0xff]   ;;  %v2030_v34 = vld [vmem:[%s3035_s1 + $0xf0] ss:$8 sps:$4 sm:$0xff]   ;;  %v2034_v35 = vld [vmem:[%s3035_s1 + $0xe4] ss:$8 sps:$4 sm:$0xff]  }
   0xd   :  { %687 = vmatprep.subr.bf16.mxu1 %v2001_v13  ;;  %v2033_v36 = vld [vmem:[%s3035_s1 + $0x1f0] ss:$8 sps:$4 sm:$0xff]   ;;  %v2037_v37 = vld [vmem:[%s3035_s1 + $0x1e4] ss:$8 sps:$4 sm:$0xff]   ;;  %v2036_v38 = vld [vmem:[%s3035_s1 + $0xe0] ss:$8 sps:$4 sm:$0xff]  }
   0xe   :  { %v2040_v39 = vld [vmem:[%s3035_s1 + $0xd4] ss:$8 sps:$4 sm:$0xff]   ;;  %v2039_v40 = vld [vmem:[%s3035_s1 + $0x1e0] ss:$8 sps:$4 sm:$0xff]   ;;  %v2042_v42 = vld [vmem:[%s3035_s1 + $0xd0] ss:$8 sps:$4 sm:$0xff]  }
   0xf   :  { %647 = vmatpush1.bf16.msra.mxu0 %v2000_v14  ;;  %v2043_v41 = vld [vmem:[%s3035_s1 + $0x1d4] ss:$8 sps:$4 sm:$0xff]   ;;  %v2046_v43 = vld [vmem:[%s3035_s1 + $0xc4] ss:$8 sps:$4 sm:$0xff]   ;;  %v2045_v44 = vld [vmem:[%s3035_s1 + $0x1d0] ss:$8 sps:$4 sm:$0xff]  }
  0x10   :  { %648 = vmatprep.subr.bf16.mxu0 %v2004_v15  ;;  %688 = vmatpush1.bf16.msra.mxu1 %v2003_v16  ;;  %v2049_v45 = vld [vmem:[%s3035_s1 + $0x1c4] ss:$8 sps:$4 sm:$0xff]   ;;  %v2048_v47 = vld [vmem:[%s3035_s1 + $0xc0] ss:$8 sps:$4 sm:$0xff]   ;;  %v2052_v49 = vld [vmem:[%s3035_s1 + $0xb4] ss:$8 sps:$4 sm:$0xff]  }
  0x11   :  { %689 = vmatprep.subr.bf16.mxu1 %v2007_v17  ;;  %v23_v46 = vld [vmem:[%s3034_s0 + $0x8] sm:$0xff]  ;;  %v25_v50 = vld [vmem:[%s3034_s0 + $0x18] sm:$0xff]  ;;  %v22_v4 = vld [vmem:[%s3034_s0] sm:$0xff] }
  0x12   :  { %v30_v48 = vpack.c.bf16 %v23_v46, %v23_v46  ;;  %v2051_v51 = vld [vmem:[%s3035_s1 + $0x1c0] ss:$8 sps:$4 sm:$0xff]   ;;  %v32_v52 = vpack.c.bf16 %v25_v50, %v25_v50  ;;  %v2055_v53 = vld [vmem:[%s3035_s1 + $0x1b4] ss:$8 sps:$4 sm:$0xff]   ;;  %v2054_v54 = vld [vmem:[%s3035_s1 + $0xb0] ss:$8 sps:$4 sm:$0xff]   ;;  %v29_v7 = vpack.c.bf16 %v22_v4, %v22_v4 }
  0x13   :  { %649 = vmatpush1.bf16.msra.mxu0 %v2006_v18  ;;  %v2058_v55 = vld [vmem:[%s3035_s1 + $0xa4] ss:$8 sps:$4 sm:$0xff]   ;;  %v2057_v56 = vld [vmem:[%s3035_s1 + $0x1b0] ss:$8 sps:$4 sm:$0xff]   ;;  %v2060_v58 = vld [vmem:[%s3035_s1 + $0xa0] ss:$8 sps:$4 sm:$0xff]  }
  0x14   :  { %650 = vmatprep.subr.bf16.mxu0 %v2010_v19  ;;  %690 = vmatpush1.bf16.msra.mxu1 %v2009_v20  ;;  %v2061_v57 = vld [vmem:[%s3035_s1 + $0x1a4] ss:$8 sps:$4 sm:$0xff]   ;;  %v2064_v59 = vld [vmem:[%s3035_s1 + $0x94] ss:$8 sps:$4 sm:$0xff]   ;;  %v2063_v60 = vld [vmem:[%s3035_s1 + $0x1a0] ss:$8 sps:$4 sm:$0xff]  }
  0x15   :  { %691 = vmatprep.subr.bf16.mxu1 %v2013_v21  ;;  %672 = vmatprep.mubr.bf16.mxu0 %v30_v48  ;;  %v2067_v61 = vld [vmem:[%s3035_s1 + $0x194] ss:$8 sps:$4 sm:$0xff]   ;;  %v2066_v62 = vld [vmem:[%s3035_s1 + $0x90] ss:$8 sps:$4 sm:$0xff]   ;;  %v2070_v63 = vld [vmem:[%s3035_s1 + $0x84] ss:$8 sps:$4 sm:$0xff]  }
  0x16   :  { %713 = vmatprep.mubr.bf16.mxu1 %v32_v52  ;;  %v2069_v0 = vld [vmem:[%s3035_s1 + $0x190] ss:$8 sps:$4 sm:$0xff]   ;;  %v2072_v1 = vld [vmem:[%s3035_s1 + $0x80] ss:$8 sps:$4 sm:$0xff]   ;;  %v2073_v2 = vld [vmem:[%s3035_s1 + $0x184] ss:$8 sps:$4 sm:$0xff]  }
  0x17   :  { %651 = vmatpush1.bf16.msra.mxu0 %v2012_v22  ;;  %v2075_v3 = vld [vmem:[%s3035_s1 + $0x180] ss:$8 sps:$4 sm:$0xff]   ;;  %v2078_v5 = vld [vmem:[%s3035_s1 + $0x274] ss:$8 sps:$4 sm:$0xff]   ;;  %v2076_v8 = vld [vmem:[%s3035_s1 + $0x270] ss:$8 sps:$4 sm:$0xff]  }
  0x18   :  { %652 = vmatprep.subr.bf16.mxu0 %v2016_v23  ;;  %692 = vmatpush1.bf16.msra.mxu1 %v2015_v24  ;;  %v24_v6 = vld [vmem:[%s3034_s0 + $0x10] sm:$0xff]  ;;  %v2081_v9 = vld [vmem:[%s3035_s1 + $0x264] ss:$8 sps:$4 sm:$0xff]   ;;  %v2121_v11 = vld [vmem:[%s3035_s1 + $0x300] ss:$8 sps:$4 sm:$0xff]   ;;  %v2317_v19 = vmov 0  }
  0x19   :  { %693 = vmatprep.subr.bf16.mxu1 %v2019_v25  ;;  %v31_v10 = vpack.c.bf16 %v24_v6, %v24_v6  ;;  %v2123_v12 = vld [vmem:[%s3035_s1 + $0x304] ss:$8 sps:$4 sm:$0xff]   ;;  %v2079_v13 = vld [vmem:[%s3035_s1 + $0x260] ss:$8 sps:$4 sm:$0xff]   ;;  %v2084_v14 = vld [vmem:[%s3035_s1 + $0x254] ss:$8 sps:$4 sm:$0xff]  }
  0x1a   :  { %v28_v15 = vld [vmem:[%s3034_s0 + $0x30] sm:$0xff]  ;;  %v27_v16 = vld [vmem:[%s3034_s0 + $0x28] sm:$0xff] }
  0x1b   :  { %653 = vmatpush1.bf16.msra.mxu0 %v2018_v26  ;;  %v34_v17 = vpack.c.bf16 %v27_v16, %v27_v16  ;;  %v2082_v18 = vld [vmem:[%s3035_s1 + $0x250] ss:$8 sps:$4 sm:$0xff]   ;;  %v2087_v20 = vld [vmem:[%s3035_s1 + $0x244] ss:$8 sps:$4 sm:$0xff]   ;;  %v35_v21 = vpack.c.bf16 %v28_v15, %v28_v15  ;;  %v2085_v22 = vld [vmem:[%s3035_s1 + $0x240] ss:$8 sps:$4 sm:$0xff]  }
  0x1c   :  { %654 = vmatprep.subr.bf16.mxu0 %v2022_v27  ;;  %694 = vmatpush1.bf16.msra.mxu1 %v2021_v28  ;;  %v2090_v23 = vld [vmem:[%s3035_s1 + $0x234] ss:$8 sps:$4 sm:$0xff]   ;;  %v2088_v24 = vld [vmem:[%s3035_s1 + $0x230] ss:$8 sps:$4 sm:$0xff]   ;;  %v2093_v25 = vld [vmem:[%s3035_s1 + $0x224] ss:$8 sps:$4 sm:$0xff]  }
  0x1d   :  { %695 = vmatprep.subr.bf16.mxu1 %v2025_v29  ;;  %v2091_v26 = vld [vmem:[%s3035_s1 + $0x220] ss:$8 sps:$4 sm:$0xff]   ;;  %v2096_v27 = vld [vmem:[%s3035_s1 + $0x214] ss:$8 sps:$4 sm:$0xff]   ;;  %v2094_v28 = vld [vmem:[%s3035_s1 + $0x210] ss:$8 sps:$4 sm:$0xff]  }
  0x1e   :  { %v2099_v29 = vld [vmem:[%s3035_s1 + $0x204] ss:$8 sps:$4 sm:$0xff]  }
  0x1f   :  { %655 = vmatpush1.bf16.msra.mxu0 %v2024_v30  ;;  %v2097_v30 = vld [vmem:[%s3035_s1 + $0x200] ss:$8 sps:$4 sm:$0xff]  }
  0x20   :  { %656 = vmatprep.subr.bf16.mxu0 %v2028_v31  ;;  %696 = vmatpush1.bf16.msra.mxu1 %v2027_v32  ;;  %v2102_v31 = vld [vmem:[%s3035_s1 + $0x2f4] ss:$8 sps:$4 sm:$0xff]   ;;  %v2100_v32 = vld [vmem:[%s3035_s1 + $0x2f0] ss:$8 sps:$4 sm:$0xff]  }
  0x21   :  { %697 = vmatprep.subr.bf16.mxu1 %v2031_v33  ;;  %v2105_v33 = vld [vmem:[%s3035_s1 + $0x2e4] ss:$8 sps:$4 sm:$0xff]  }
  0x23   :  { %657 = vmatpush2.bf16.msra.mxu0 %v2030_v34  ;;  %v2103_v34 = vld [vmem:[%s3035_s1 + $0x2e0] ss:$8 sps:$4 sm:$0xff]  }
  0x24   :  { %658 = vmatprep.subr.bf16.mxu0 %v2034_v35  ;;  %698 = vmatpush2.bf16.msra.mxu1 %v2033_v36  ;;  %v2108_v35 = vld [vmem:[%s3035_s1 + $0x2d4] ss:$8 sps:$4 sm:$0xff]   ;;  %v2106_v36 = vld [vmem:[%s3035_s1 + $0x2d0] ss:$8 sps:$4 sm:$0xff]  }
  0x25   :  { %699 = vmatprep.subr.bf16.mxu1 %v2037_v37  ;;  %v2111_v37 = vld [vmem:[%s3035_s1 + $0x2c4] ss:$8 sps:$4 sm:$0xff]  }
  0x27   :  { %659 = vmatpush2.bf16.msra.mxu0 %v2036_v38  ;;  %v2109_v38 = vld [vmem:[%s3035_s1 + $0x2c0] ss:$8 sps:$4 sm:$0xff]  }
  0x28   :  { %660 = vmatprep.subr.bf16.mxu0 %v2040_v39  ;;  %700 = vmatpush2.bf16.msra.mxu1 %v2039_v40  ;;  %v2114_v39 = vld [vmem:[%s3035_s1 + $0x2b4] ss:$8 sps:$4 sm:$0xff]  }
  0x29   :  { %701 = vmatprep.subr.bf16.mxu1 %v2043_v41 }
  0x2b   :  { %661 = vmatpush2.bf16.msra.mxu0 %v2042_v42 }
  0x2c   :  { %662 = vmatprep.subr.bf16.mxu0 %v2046_v43  ;;  %702 = vmatpush2.bf16.msra.mxu1 %v2045_v44 }
  0x2d   :  { %703 = vmatprep.subr.bf16.mxu1 %v2049_v45 }
  0x2f   :  { %663 = vmatpush2.bf16.msra.mxu0 %v2048_v47 }
  0x30   :  { %664 = vmatprep.subr.bf16.mxu0 %v2052_v49  ;;  %704 = vmatpush2.bf16.msra.mxu1 %v2051_v51 }
  0x31   :  { %705 = vmatprep.subr.bf16.mxu1 %v2055_v53 }
  0x33   :  { %665 = vmatpush2.bf16.msra.mxu0 %v2054_v54 }
  0x34   :  { %666 = vmatprep.subr.bf16.mxu0 %v2058_v55  ;;  %706 = vmatpush2.bf16.msra.mxu1 %v2057_v56 }
  0x35   :  { %707 = vmatprep.subr.bf16.mxu1 %v2061_v57 }
  0x37   :  { %667 = vmatpush2.bf16.msra.mxu0 %v2060_v58 }
  0x38   :  { %668 = vmatprep.subr.bf16.mxu0 %v2064_v59  ;;  %708 = vmatpush2.bf16.msra.mxu1 %v2063_v60 }
  0x39   :  { %709 = vmatprep.subr.bf16.mxu1 %v2067_v61 }
  0x3b   :  { %669 = vmatpush2.bf16.msra.mxu0 %v2066_v62 }
  0x3c   :  { %670 = vmatprep.subr.bf16.mxu0 %v2070_v63  ;;  %710 = vmatpush2.bf16.msra.mxu1 %v2069_v0 }
  0x3d   :  { %711 = vmatprep.subr.bf16.mxu1 %v2073_v2 }
  0x3f   :  { %671 = vmatpush2.bf16.msra.mxu0 %v2072_v1 }
  0x40   :  { %722 = vmatprep.subr.bf16.mxu0 %v2078_v5  ;;  %712 = vmatpush2.bf16.msra.mxu1 %v2075_v3 }
  0x41   :  { %777 = vmatprep.subr.bf16.mxu1 %v2123_v12 }
  0x42   :  { %673 = vmatmul.mubr.bf16.vlgmr.msra.gmra.mxu0 %v29_v7 }
  0x43   :  { %723 = vmatpush1.bf16.msra.mxu0 %v2076_v8  ;;  %714 = vmatmul.mubr.bf16.vlgmr.msra.gmra.mxu1 %v31_v10 }
  0x44   :  { %724 = vmatprep.subr.bf16.mxu0 %v2081_v9  ;;  %778 = vmatpush1.bf16.msra.mxu1 %v2121_v11 }
  0x45   :  { %795 = vmatprep.mubr.bf16.mxu1 %v2317_v19  ;;  %754 = vmatprep.mubr.bf16.mxu0 %v34_v17 }
  0x47   :  { %725 = vmatpush1.bf16.msra.mxu0 %v2079_v13 }
  0x48   :  { %726 = vmatprep.subr.bf16.mxu0 %v2084_v14 }
  0x4b   :  { %727 = vmatpush1.bf16.msra.mxu0 %v2082_v18  ;;  %1841 = vmatmul.mubr.msk.bf16.vlgmr.msra.gmra.mxu1 %vm636_vm0, %v35_v21 }
  0x4c   :  { %728 = vmatprep.subr.bf16.mxu0 %v2087_v20 }
  0x4f   :  { %729 = vmatpush1.bf16.msra.mxu0 %v2085_v22 }
  0x50   :  { %730 = vmatprep.subr.bf16.mxu0 %v2090_v23 }
  0x53   :  { %731 = vmatpush1.bf16.msra.mxu0 %v2088_v24 }
  0x54   :  { %732 = vmatprep.subr.bf16.mxu0 %v2093_v25 }
  0x57   :  { %733 = vmatpush1.bf16.msra.mxu0 %v2091_v26 }
  0x58   :  { %734 = vmatprep.subr.bf16.mxu0 %v2096_v27 }
  0x5b   :  { %735 = vmatpush1.bf16.msra.mxu0 %v2094_v28 }
  0x5c   :  { %736 = vmatprep.subr.bf16.mxu0 %v2099_v29 }
  0x5f   :  { %737 = vmatpush1.bf16.msra.mxu0 %v2097_v30 }
  0x60   :  { %738 = vmatprep.subr.bf16.mxu0 %v2102_v31 }
  0x63   :  { %739 = vmatpush2.bf16.msra.mxu0 %v2100_v32 }
  0x64   :  { %740 = vmatprep.subr.bf16.mxu0 %v2105_v33 }
  0x67   :  { %741 = vmatpush2.bf16.msra.mxu0 %v2103_v34 }
  0x68   :  { %742 = vmatprep.subr.bf16.mxu0 %v2108_v35 }
  0x6b   :  { %743 = vmatpush2.bf16.msra.mxu0 %v2106_v36 }
  0x6c   :  { %744 = vmatprep.subr.bf16.mxu0 %v2111_v37 }
  0x6d   :  { %10 = vsyncpa [#allocation3], 0  ;;  %v2112_v40 = vld [vmem:[%s3035_s1 + $0x2b0] ss:$8 sps:$4 sm:$0xff]   ;;  %v2117_v41 = vld [vmem:[%s3035_s1 + $0x2a4] ss:$8 sps:$4 sm:$0xff]  }
  0x6e   :  { %v2115_v42 = vld [vmem:[%s3035_s1 + $0x2a0] ss:$8 sps:$4 sm:$0xff]   ;;  %v2120_v43 = vld [vmem:[%s3035_s1 + $0x294] ss:$8 sps:$4 sm:$0xff]   ;;  %v2118_v44 = vld [vmem:[%s3035_s1 + $0x290] ss:$8 sps:$4 sm:$0xff]  }
  0x6f   :  { %745 = vmatpush2.bf16.msra.mxu0 %v2109_v38  ;;  %v2126_v45 = vld [vmem:[%s3035_s1 + $0x284] ss:$8 sps:$4 sm:$0xff]   ;;  %v2124_v46 = vld [vmem:[%s3035_s1 + $0x280] ss:$8 sps:$4 sm:$0xff]   ;;  %v2132_v52 = vld [vmem:[%s3037_s3 + $0x194] ss:$28 sps:$4 sm:$0xff]  }
  0x70   :  { %746 = vmatprep.subr.bf16.mxu0 %v2114_v39  ;;  %v26_v47 = vld [vmem:[%s3034_s0 + $0x20] sm:$0xff]  ;;  %v2129_v50 = vld [vmem:[%s3037_s3 + $0x18c] ss:$28 sps:$4 sm:$0xff]   ;;  %v2135_v53 = vld [vmem:[%s3037_s3 + $0x154] ss:$28 sps:$4 sm:$0xff]  }
  0x71   :  { %v33_v48 = vpack.c.bf16 %v26_v47, %v26_v47  ;;  %v2127_v49 = vld [vmem:[%s3037_s3 + $0x188] ss:$28 sps:$4 sm:$0xff]   ;;  %v2130_v51 = vld [vmem:[%s3037_s3 + $0x190] ss:$28 sps:$4 sm:$0xff]   ;;  %1559 = vmatprep.subr.bf16.mxu1 %v2129_v50  ;;  %v2138_v54 = vld [vmem:[%s3037_s3 + $0x15c] ss:$28 sps:$4 sm:$0xff]  }
  0x72   :  { %1560 = vmatpush1.bf16.msra.mxu1 %v2127_v49  ;;  %v2133_v55 = vld [vmem:[%s3037_s3 + $0x150] ss:$28 sps:$4 sm:$0xff]   ;;  %v2136_v56 = vld [vmem:[%s3037_s3 + $0x158] ss:$28 sps:$4 sm:$0xff]   ;;  %v2144_v58 = vld [vmem:[%s3037_s3 + $0x124] ss:$28 sps:$4 sm:$0xff]  }
  0x73   :  { %747 = vmatpush2.bf16.msra.mxu0 %v2112_v40  ;;  %1561 = vmatprep.subr.bf16.mxu1 %v2135_v53  ;;  %v2141_v57 = vld [vmem:[%s3037_s3 + $0x11c] ss:$28 sps:$4 sm:$0xff]   ;;  %v2147_v61 = vld [vmem:[%s3037_s3 + $0xe4] ss:$28 sps:$4 sm:$0xff]   ;;  %v2150_v62 = vld [vmem:[%s3037_s3 + $0xec] ss:$28 sps:$4 sm:$0xff]  }
  0x74   :  { %748 = vmatprep.subr.bf16.mxu0 %v2117_v41  ;;  %v2139_v59 = vld [vmem:[%s3037_s3 + $0x118] ss:$28 sps:$4 sm:$0xff]   ;;  %v2142_v60 = vld [vmem:[%s3037_s3 + $0x120] ss:$28 sps:$4 sm:$0xff]   ;;  %v2148_v0 = vld [vmem:[%s3037_s3 + $0xe8] ss:$28 sps:$4 sm:$0xff]  }
  0x75   :  { %v2145_v63 = vld [vmem:[%s3037_s3 + $0xe0] ss:$28 sps:$4 sm:$0xff]   ;;  %v2153_v1 = vld [vmem:[%s3037_s3 + $0xac] ss:$28 sps:$4 sm:$0xff]   ;;  %v2156_v2 = vld [vmem:[%s3037_s3 + $0xb4] ss:$28 sps:$4 sm:$0xff]  }
  0x76   :  { %1562 = vmatpush1.bf16.msra.mxu1 %v2133_v55  ;;  %v2151_v3 = vld [vmem:[%s3037_s3 + $0xa8] ss:$28 sps:$4 sm:$0xff]   ;;  %v2154_v4 = vld [vmem:[%s3037_s3 + $0xb0] ss:$28 sps:$4 sm:$0xff]   ;;  %v2162_v6 = vld [vmem:[%s3037_s3 + $0x7c] ss:$28 sps:$4 sm:$0xff]  }
  0x77   :  { %749 = vmatpush2.bf16.msra.mxu0 %v2115_v42  ;;  %1563 = vmatprep.subr.bf16.mxu1 %v2141_v57  ;;  %v2159_v5 = vld [vmem:[%s3037_s3 + $0x74] ss:$28 sps:$4 sm:$0xff]   ;;  %v2165_v9 = vld [vmem:[%s3037_s3 + $0x3c] ss:$28 sps:$4 sm:$0xff]   ;;  %v2168_v10 = vld [vmem:[%s3037_s3 + $0x44] ss:$28 sps:$4 sm:$0xff]  }
  0x78   :  { %750 = vmatprep.subr.bf16.mxu0 %v2120_v43  ;;  %v2157_v7 = vld [vmem:[%s3037_s3 + $0x70] ss:$28 sps:$4 sm:$0xff]   ;;  %v2160_v8 = vld [vmem:[%s3037_s3 + $0x78] ss:$28 sps:$4 sm:$0xff]   ;;  %v2166_v12 = vld [vmem:[%s3037_s3 + $0x40] ss:$28 sps:$4 sm:$0xff]  }
  0x79   :  { %v2163_v11 = vld [vmem:[%s3037_s3 + $0x38] ss:$28 sps:$4 sm:$0xff]   ;;  %v2171_v13 = vld [vmem:[%s3037_s3 + $0x4] ss:$28 sps:$4 sm:$0xff]   ;;  %v2174_v14 = vld [vmem:[%s3037_s3 + $0xc] ss:$28 sps:$4 sm:$0xff]  }
  0x7a   :  { %1564 = vmatpush1.bf16.msra.mxu1 %v2139_v59  ;;  %v2169_v15 = vld [vmem:[%s3037_s3] ss:$28 sps:$4 sm:$0xff]   ;;  %v2172_v16 = vld [vmem:[%s3037_s3 + $0x8] ss:$28 sps:$4 sm:$0xff]   ;;  %v2180_v18 = vld [vmem:[%s3037_s3 + $0x354] ss:$28 sps:$4 sm:$0xff]  }
  0x7b   :  { %751 = vmatpush2.bf16.msra.mxu0 %v2118_v44  ;;  %1565 = vmatprep.subr.bf16.mxu1 %v2147_v61  ;;  %v2177_v17 = vld [vmem:[%s3037_s3 + $0x34c] ss:$28 sps:$4 sm:$0xff]   ;;  %v2183_v21 = vld [vmem:[%s3037_s3 + $0x314] ss:$28 sps:$4 sm:$0xff]   ;;  %v2186_v22 = vld [vmem:[%s3037_s3 + $0x31c] ss:$28 sps:$4 sm:$0xff]  }
  0x7c   :  { %752 = vmatprep.subr.bf16.mxu0 %v2126_v45  ;;  %v2175_v19 = vld [vmem:[%s3037_s3 + $0x348] ss:$28 sps:$4 sm:$0xff]   ;;  %v2178_v20 = vld [vmem:[%s3037_s3 + $0x350] ss:$28 sps:$4 sm:$0xff]   ;;  %v2184_v24 = vld [vmem:[%s3037_s3 + $0x318] ss:$28 sps:$4 sm:$0xff]  }
  0x7d   :  { %v2181_v23 = vld [vmem:[%s3037_s3 + $0x310] ss:$28 sps:$4 sm:$0xff]   ;;  %v2189_v25 = vld [vmem:[%s3037_s3 + $0x2dc] ss:$28 sps:$4 sm:$0xff]   ;;  %v2192_v26 = vld [vmem:[%s3037_s3 + $0x2e4] ss:$28 sps:$4 sm:$0xff]  }
  0x7e   :  { %1566 = vmatpush1.bf16.msra.mxu1 %v2145_v63  ;;  %v2187_v27 = vld [vmem:[%s3037_s3 + $0x2d8] ss:$28 sps:$4 sm:$0xff]   ;;  %v2190_v28 = vld [vmem:[%s3037_s3 + $0x2e0] ss:$28 sps:$4 sm:$0xff]   ;;  %v2198_v30 = vld [vmem:[%s3037_s3 + $0x2ac] ss:$28 sps:$4 sm:$0xff]   ;;  %v136_v63 = vlaneseq }
  0x7f   :  { %753 = vmatpush2.bf16.msra.mxu0 %v2124_v46  ;;  %1567 = vmatprep.subr.bf16.mxu1 %v2153_v1  ;;  %v2195_v29 = vld [vmem:[%s3037_s3 + $0x2a4] ss:$28 sps:$4 sm:$0xff]   ;;  %v2201_v33 = vld [vmem:[%s3037_s3 + $0x26c] ss:$28 sps:$4 sm:$0xff]   ;;  %v2204_v34 = vld [vmem:[%s3037_s3 + $0x274] ss:$28 sps:$4 sm:$0xff]  }
  0x80   :  { %1600 = vmatprep.subr.bf16.mxu0 %v2132_v52  ;;  %v2193_v31 = vld [vmem:[%s3037_s3 + $0x2a0] ss:$28 sps:$4 sm:$0xff]   ;;  %v2196_v32 = vld [vmem:[%s3037_s3 + $0x2a8] ss:$28 sps:$4 sm:$0xff]   ;;  %v2202_v36 = vld [vmem:[%s3037_s3 + $0x270] ss:$28 sps:$4 sm:$0xff]  }
  0x81   :  { %v2199_v35 = vld [vmem:[%s3037_s3 + $0x268] ss:$28 sps:$4 sm:$0xff]   ;;  %v2207_v37 = vld [vmem:[%s3037_s3 + $0x234] ss:$28 sps:$4 sm:$0xff]   ;;  %v2210_v40 = vld [vmem:[%s3037_s3 + $0x23c] ss:$28 sps:$4 sm:$0xff]  }
  0x82   :  { %755 = vmatmul.mubr.bf16.vlgmr.msra.gmra.mxu0 %v33_v48  ;;  %1568 = vmatpush1.bf16.msra.mxu1 %v2151_v3  ;;  %v2205_v38 = vld [vmem:[%s3037_s3 + $0x230] ss:$28 sps:$4 sm:$0xff]   ;;  %v2208_v39 = vld [vmem:[%s3037_s3 + $0x238] ss:$28 sps:$4 sm:$0xff]   ;;  %v2216_v42 = vld [vmem:[%s3037_s3 + $0x204] ss:$28 sps:$4 sm:$0xff]  }
  0x83   :  { %1601 = vmatpush1.bf16.msra.mxu0 %v2130_v51  ;;  %1569 = vmatprep.subr.bf16.mxu1 %v2159_v5  ;;  %v2213_v41 = vld [vmem:[%s3037_s3 + $0x1fc] ss:$28 sps:$4 sm:$0xff]   ;;  %v2219_v45 = vld [vmem:[%s3037_s3 + $0x1c4] ss:$28 sps:$4 sm:$0xff]   ;;  %v2222_v46 = vld [vmem:[%s3037_s3 + $0x1cc] ss:$28 sps:$4 sm:$0xff]  }
  0x84   :  { %1602 = vmatprep.subr.bf16.mxu0 %v2138_v54  ;;  %v2211_v43 = vld [vmem:[%s3037_s3 + $0x1f8] ss:$28 sps:$4 sm:$0xff]   ;;  %v2214_v44 = vld [vmem:[%s3037_s3 + $0x200] ss:$28 sps:$4 sm:$0xff]   ;;  %v2220_v48 = vld [vmem:[%s3037_s3 + $0x1c8] ss:$28 sps:$4 sm:$0xff]  }
  0x85   :  { %v2217_v47 = vld [vmem:[%s3037_s3 + $0x1c0] ss:$28 sps:$4 sm:$0xff]  }
  0x86   :  { %1570 = vmatpush1.bf16.msra.mxu1 %v2157_v7  ;;  %v2225_v49 = vld [vmem:[%s3037_s3 + $0x19c] ss:$28 sps:$4 sm:$0xff]  }
  0x87   :  { %1603 = vmatpush1.bf16.msra.mxu0 %v2136_v56  ;;  %1571 = vmatprep.subr.bf16.mxu1 %v2165_v9  ;;  %v2226_v50 = vld [vmem:[%s3037_s3 + $0x360] ss:$28 sps:$4 sm:$0xff]  }
  0x88   :  { %1604 = vmatprep.subr.bf16.mxu0 %v2144_v58 }
  0x8a   :  { %1572 = vmatpush1.bf16.msra.mxu1 %v2163_v11 }
  0x8b   :  { %1605 = vmatpush1.bf16.msra.mxu0 %v2142_v60  ;;  %1573 = vmatprep.subr.bf16.mxu1 %v2171_v13 }
  0x8c   :  { %1606 = vmatprep.subr.bf16.mxu0 %v2150_v62 }
  0x8e   :  { %1574 = vmatpush1.bf16.msra.mxu1 %v2169_v15 }
  0x8f   :  { %1607 = vmatpush1.bf16.msra.mxu0 %v2148_v0  ;;  %1575 = vmatprep.subr.bf16.mxu1 %v2177_v17  ;;  %v2863_v0 = vshrl.u32 %v136_v63, 7  ;;  %v2269_v63 = vld [vmem:[%s3037_s3 + $0x2e8] ss:$28 sps:$4 sm:$0xff]  }
  0x90   :  { %1608 = vmatprep.subr.bf16.mxu0 %v2156_v2  ;;  %v134_v2 = vld [vmem:[%s3036_s2] sm:$0x3] }
  0x91   :  { %v138_v1 = vsub.s32 0, %v2863_v0  ;;  %v142_v3 = vsub.s32 1, %v2863_v0 }
  0x92   :  { %1576 = vmatpush2.bf16.msra.mxu1 %v2175_v19 }
  0x93   :  { %1609 = vmatpush1.bf16.msra.mxu0 %v2154_v4  ;;  %1577 = vmatprep.subr.bf16.mxu1 %v2183_v21  ;;  %v139_v4 = vrot.slane %v134_v2, %v138_v1  ;;  %v143_v5 = vrot.slane %v134_v2, %v142_v3  ;;  %v2274_v2 = vld [vmem:[%s3037_s3 + $0x2b4] ss:$28 sps:$4 sm:$0xff]  }
  0x94   :  { %1610 = vmatprep.subr.bf16.mxu0 %v2162_v6 }
  0x96   :  { %1578 = vmatpush2.bf16.msra.mxu1 %v2181_v23 }
  0x97   :  { %1611 = vmatpush1.bf16.msra.mxu0 %v2160_v8  ;;  %1579 = vmatprep.subr.bf16.mxu1 %v2189_v25 }
  0x98   :  { %1612 = vmatprep.subr.bf16.mxu0 %v2168_v10 }
  0x9a   :  { %1580 = vmatpush2.bf16.msra.mxu1 %v2187_v27  ;;  %v2223_v27 = vld [vmem:[%s3037_s3 + $0x198] ss:$28 sps:$4 sm:$0xff]  }
  0x9b   :  { %1613 = vmatpush1.bf16.msra.mxu0 %v2166_v12  ;;  %1581 = vmatprep.subr.bf16.mxu1 %v2195_v29 }
  0x9c   :  { %1614 = vmatprep.subr.bf16.mxu0 %v2174_v14 }
  0x9e   :  { %1582 = vmatpush2.bf16.msra.mxu1 %v2193_v31  ;;  %v2231_v31 = vld [vmem:[%s3037_s3 + $0x328] ss:$28 sps:$4 sm:$0xff]  }
  0x9f   :  { %1615 = vmatpush1.bf16.msra.mxu0 %v2172_v16  ;;  %1583 = vmatprep.subr.bf16.mxu1 %v2201_v33  ;;  %v2232_v33 = vld [vmem:[%s3037_s3 + $0x168] ss:$28 sps:$4 sm:$0xff]  }
  0xa0   :  { %1616 = vmatprep.subr.bf16.mxu0 %v2180_v18 }
  0xa2   :  { %1584 = vmatpush2.bf16.msra.mxu1 %v2199_v35  ;;  %v2236_v35 = vld [vmem:[%s3037_s3 + $0x2f0] ss:$28 sps:$4 sm:$0xff]  }
  0xa3   :  { %1617 = vmatpush2.bf16.msra.mxu0 %v2178_v20  ;;  %1585 = vmatprep.subr.bf16.mxu1 %v2207_v37  ;;  %v2237_v37 = vld [vmem:[%s3037_s3 + $0x130] ss:$28 sps:$4 sm:$0xff]  }
  0xa4   :  { %1618 = vmatprep.subr.bf16.mxu0 %v2186_v22 }
  0xa6   :  { %1586 = vmatpush2.bf16.msra.mxu1 %v2205_v38  ;;  %v2240_v38 = vld [vmem:[%s3037_s3 + $0xf4] ss:$28 sps:$4 sm:$0xff]  }
  0xa7   :  { %1619 = vmatpush2.bf16.msra.mxu0 %v2184_v24  ;;  %1587 = vmatprep.subr.bf16.mxu1 %v2213_v41  ;;  %v2242_v41 = vld [vmem:[%s3037_s3 + $0xf8] ss:$28 sps:$4 sm:$0xff]  }
  0xa8   :  { %1620 = vmatprep.subr.bf16.mxu0 %v2192_v26 }
  0xaa   :  { %1588 = vmatpush2.bf16.msra.mxu1 %v2211_v43  ;;  %v2246_v43 = vld [vmem:[%s3037_s3 + $0x280] ss:$28 sps:$4 sm:$0xff]  }
  0xab   :  { %1621 = vmatpush2.bf16.msra.mxu0 %v2190_v28  ;;  %1589 = vmatprep.subr.bf16.mxu1 %v2219_v45  ;;  %v2227_v28 = vld [vmem:[%s3037_s3 + $0x1a0] ss:$28 sps:$4 sm:$0xff]  }
  0xac   :  { %1622 = vmatprep.subr.bf16.mxu0 %v2198_v30  ;;  %v2230_v30 = vld [vmem:[%s3037_s3 + $0x164] ss:$28 sps:$4 sm:$0xff]  }
  0xad   :  { %v2247_v45 = vld [vmem:[%s3037_s3 + $0xc0] ss:$28 sps:$4 sm:$0xff]  }
  0xae   :  { %1590 = vmatpush2.bf16.msra.mxu1 %v2217_v47  ;;  %v2251_v47 = vld [vmem:[%s3037_s3 + $0x248] ss:$28 sps:$4 sm:$0xff]  }
  0xaf   :  { %1623 = vmatpush2.bf16.msra.mxu0 %v2196_v32  ;;  %1641 = vmatprep.subr.bf16.mxu1 %v2225_v49  ;;  %v2228_v32 = vld [vmem:[%s3037_s3 + $0x160] ss:$28 sps:$4 sm:$0xff]   ;;  %v2252_v49 = vld [vmem:[%s3037_s3 + $0x88] ss:$28 sps:$4 sm:$0xff]  }
  0xb0   :  { %1624 = vmatprep.subr.bf16.mxu0 %v2204_v34  ;;  %v2235_v34 = vld [vmem:[%s3037_s3 + $0x12c] ss:$28 sps:$4 sm:$0xff]  }
  0xb3   :  { %1625 = vmatpush2.bf16.msra.mxu0 %v2202_v36  ;;  %v2233_v36 = vld [vmem:[%s3037_s3 + $0x128] ss:$28 sps:$4 sm:$0xff]  }
  0xb4   :  { %1626 = vmatprep.subr.bf16.mxu0 %v2210_v40  ;;  %v2238_v40 = vld [vmem:[%s3037_s3 + $0xf0] ss:$28 sps:$4 sm:$0xff]  }
  0xb7   :  { %1627 = vmatpush2.bf16.msra.mxu0 %v2208_v39  ;;  %v2241_v39 = vld [vmem:[%s3037_s3 + $0x2b8] ss:$28 sps:$4 sm:$0xff]  }
  0xb8   :  { %1628 = vmatprep.subr.bf16.mxu0 %v2216_v42  ;;  %v2245_v42 = vld [vmem:[%s3037_s3 + $0xbc] ss:$28 sps:$4 sm:$0xff]  }
  0xbb   :  { %1629 = vmatpush2.bf16.msra.mxu0 %v2214_v44  ;;  %v2243_v44 = vld [vmem:[%s3037_s3 + $0xb8] ss:$28 sps:$4 sm:$0xff]  }
  0xbc   :  { %1630 = vmatprep.subr.bf16.mxu0 %v2222_v46  ;;  %v2250_v46 = vld [vmem:[%s3037_s3 + $0x84] ss:$28 sps:$4 sm:$0xff]  }
  0xbf   :  { %1631 = vmatpush2.bf16.msra.mxu0 %v2220_v48  ;;  %v2248_v48 = vld [vmem:[%s3037_s3 + $0x80] ss:$28 sps:$4 sm:$0xff]  }
  0xc0   :  { %1956 = vmatprep.subr.bf16.mxu0 %v2226_v50  ;;  %v2255_v50 = vld [vmem:[%s3037_s3 + $0x4c] ss:$28 sps:$4 sm:$0xff]  }
 0x102   :  { %v674_v51 = vpop.f32.mrf.mxu0 }
 0x103   :  { %v715_v53 = vpop.f32.mrf.mxu1  ;;  %v675_v6 = vadd.f32 %v674_v51, %v139_v4  ;;  %v2256_v51 = vld [vmem:[%s3037_s3 + $0x210] ss:$28 sps:$4 sm:$0xff]  }
 0x104   :  { %v676_v52 = vpop.f32.mrf.mxu0  ;;  %v2272_v4 = vld [vmem:[%s3037_s3 + $0x2b0] ss:$28 sps:$4 sm:$0xff]  }
 0x105   :  { %v717_v55 = vpop.f32.mrf.mxu1  ;;  %v677_v7 = vadd.f32 %v676_v52, %v143_v5  ;;  %v716_v8 = vadd.f32 %v715_v53, %v675_v6  ;;  %v2253_v52 = vld [vmem:[%s3037_s3 + $0x48] ss:$28 sps:$4 sm:$0xff]   ;;  %v2257_v53 = vld [vmem:[%s3037_s3 + $0x50] ss:$28 sps:$4 sm:$0xff]   ;;  %v2277_v5 = vld [vmem:[%s3037_s3 + $0x27c] ss:$28 sps:$4 sm:$0xff]  }
 0x106   :  { %v678_v54 = vpop.f32.mrf.mxu0  ;;  %v2275_v6 = vld [vmem:[%s3037_s3 + $0x278] ss:$28 sps:$4 sm:$0xff]  }
 0x107   :  { %v719_v57 = vpop.f32.mrf.mxu1  ;;  %v718_v10 = vadd.f32 %v717_v55, %v677_v7  ;;  %v2260_v54 = vld [vmem:[%s3037_s3 + $0x14] ss:$28 sps:$4 sm:$0xff]   ;;  %v2280_v7 = vld [vmem:[%s3037_s3 + $0x244] ss:$28 sps:$4 sm:$0xff]  }
 0x108   :  { %v679_v56 = vpop.f32.mrf.mxu0  ;;  %v2261_v55 = vld [vmem:[%s3037_s3 + $0x1d8] ss:$28 sps:$4 sm:$0xff]  }
 0x109   :  { %v720_v58 = vpop.f32.mrf.mxu1  ;;  %v2258_v56 = vld [vmem:[%s3037_s3 + $0x10] ss:$28 sps:$4 sm:$0xff]   ;;  %v2262_v57 = vld [vmem:[%s3037_s3 + $0x18] ss:$28 sps:$4 sm:$0xff]  }
 0x10a   :  { %v2265_v58 = vld [vmem:[%s3037_s3 + $0x35c] ss:$28 sps:$4 sm:$0xff]  }
 0x10b   :  { %v797_v59 = vpop.f32.mrf.mxu1 }
 0x10d   :  { %v799_v60 = vpop.f32.mrf.mxu1 }
 0x10f   :  { %v801_v61 = vpop.f32.mrf.mxu1 }
 0x110   :  { %v2266_v61 = vld [vmem:[%s3037_s3 + $0x320] ss:$28 sps:$4 sm:$0xff]  }
 0x111   :  { %v802_v62 = vpop.f32.mrf.mxu1 }
 0x112   :  { %v2271_v62 = vld [vmem:[%s3037_s3 + $0x2ec] ss:$28 sps:$4 sm:$0xff]  }
 0x142   :  { %v756_v9 = vpop.f32.mrf.mxu0 }
 0x143   :  { %v757_v11 = vadd.f32 %v756_v9, %v716_v8  ;;  %v2278_v8 = vld [vmem:[%s3037_s3 + $0x240] ss:$28 sps:$4 sm:$0xff]   ;;  %v2283_v9 = vld [vmem:[%s3037_s3 + $0x20c] ss:$28 sps:$4 sm:$0xff]  }
 0x144   :  { %v758_v12 = vpop.f32.mrf.mxu0 }
 0x145   :  { %v798_v13 = vadd.f32 %v797_v59, %v757_v11  ;;  %v759_v14 = vadd.f32 %v758_v12, %v718_v10  ;;  %v2263_v59 = vld [vmem:[%s3037_s3 + $0x358] ss:$28 sps:$4 sm:$0xff]   ;;  %v2281_v10 = vld [vmem:[%s3037_s3 + $0x208] ss:$28 sps:$4 sm:$0xff]   ;;  %v2284_v12 = vld [vmem:[%s3037_s3 + $0x1d0] ss:$28 sps:$4 sm:$0xff]  }
 0x146   :  { %v760_v15 = vpop.f32.mrf.mxu0  ;;  %v2286_v11 = vld [vmem:[%s3037_s3 + $0x1d4] ss:$28 sps:$4 sm:$0xff]  }
 0x147   :  { %v1842_v16 = vmul.f32 -1.442695, %v798_v13  ;;  %v800_v17 = vadd.f32 %v799_v60, %v759_v14  ;;  %v2268_v60 = vld [vmem:[%s3037_s3 + $0x324] ss:$28 sps:$4 sm:$0xff]   ;;  %v958_v13 = vsub.s32 2, %v2863_v0  ;;  %v962_v15 = vsub.s32 3, %v2863_v0 }
 0x148   :  { %v761_v18 = vpop.f32.mrf.mxu0  ;;  %v946_v14 = vld [vmem:[%s3038_s4] sm:$0x7f]  ;;  %s2318_s3 = smov [#allocation2]  }
 0x149   :  { %2287 = vpow2.f32 %v1842_v16  ;;  %v1843_v19 = vmul.f32 -1.442695, %v800_v17  ;;  %v951_v16 = vrot.slane %v946_v14, %v138_v1  ;;  %v959_v17 = vrot.slane %v946_v14, %v958_v13  ;;  %s1735_s4 = sshll.u32 %s2318_s3, 4  ;;  %s1736_s4 = int_to_ptr.vmem [resolvable:$true] %s1735_s4 }
 0x14a   :  { %v955_v18 = vrot.slane %v946_v14, %v142_v3  ;;  %s2295_s0 = scalar_lea.vmem %s1736_s4, 896  ;;  %p2300_p1 = scmp.lt.s32.totalorder %s1736_s4, %s1736_s4 }
 0x14b   :  { %2289 = vpow2.f32 %v1843_v19  ;;  %v963_v19 = vrot.slane %v946_v14, %v962_v15  ;;  %p2296_p0 = scmp.ne.s32.totalorder %s1736_s4, %s2295_s0  ;;  %p2301_p2 = scmp.lt.s32.totalorder %s2295_s0, %s2295_s0 }
 0x14d   :  { %p2302_p3 = por %p2301_p2, %p2300_p1 }
 0x14f   :  { %p2303_p4 = pnand %p2302_p3, %p2296_p0 }
 0x156   :  { %v2288_v20 = vpop.eup %2287 }
 0x157   :  { %v810_v21 = vadd.f32 1.0, %v2288_v20 }
 0x158   :  { %v2290_v22 = vpop.eup %2289 }
 0x159   :  { %v811_v23 = vadd.f32 1.0, %v2290_v22  ;;  %2291 = vrcp.f32 %v810_v21 }
 0x15b   :  { %2293 = vrcp.f32 %v811_v23 }
 0x166   :  { %v2292_v24 = vpop.eup %2291 }
 0x167   :  { %v2880_v29 = vpack.c.bf16 %v2292_v24, %v2292_v24 }
 0x168   :  { %v2294_v25 = vpop.eup %2293 }
 0x169   :  { %v817_v26 = vpack.c.bf16 %v2294_v25, %v2294_v25 }
 0x16b   :  { %1591 = vmatprep.mubr.bf16.mxu1 %v817_v26  ;;  %1632 = vmatprep.mubr.bf16.mxu0 %v817_v26 }
 0x16c   :  { %1592 = vmatmul.mubr.bf16.vlgmr.msra.gmra.mxu1 %v2880_v29  ;;  %1633 = vmatmul.mubr.bf16.vlgmr.msra.gmra.mxu0 %v2880_v29 }
 0x16d   :  { %1642 = vmatpush1.bf16.msra.mxu1 %v2223_v27  ;;  %1957 = vmatpush3.bf16.msra.mxu0 %v2227_v28 }
 0x16e   :  { %1673 = vmatprep.mubr.bf16.mxu1 %v817_v26  ;;  %1714 = vmatprep.mubr.bf16.mxu0 %v817_v26 }
 0x16f   :  { %1643 = vmatprep.subr.bf16.mxu1 %v2230_v30  ;;  %1958 = vmatprep.subr.bf16.mxu0 %v2231_v31  ;;  %v974_v31 = vsub.s32 6, %v2863_v0 }
 0x171   :  { %1644 = vmatpush1.bf16.msra.mxu1 %v2228_v32  ;;  %1959 = vmatpush3.bf16.msra.mxu0 %v2232_v33  ;;  %v975_v32 = vrot.slane %v946_v14, %v974_v31 }
 0x172   :  { %1645 = vmatprep.subr.bf16.mxu1 %v2235_v34  ;;  %1960 = vmatprep.subr.bf16.mxu0 %v2236_v35 }
 0x175   :  { %1646 = vmatpush1.bf16.msra.mxu1 %v2233_v36  ;;  %1961 = vmatpush3.bf16.msra.mxu0 %v2237_v37 }
 0x176   :  { %1647 = vmatprep.subr.bf16.mxu1 %v2240_v38  ;;  %1962 = vmatprep.subr.bf16.mxu0 %v2241_v39  ;;  %v966_v38 = vsub.s32 4, %v2863_v0  ;;  %v970_v39 = vsub.s32 5, %v2863_v0 }
 0x179   :  { %1648 = vmatpush1.bf16.msra.mxu1 %v2238_v40  ;;  %1963 = vmatpush3.bf16.msra.mxu0 %v2242_v41  ;;  %v967_v40 = vrot.slane %v946_v14, %v966_v38  ;;  %v971_v41 = vrot.slane %v946_v14, %v970_v39 }
 0x17a   :  { %1649 = vmatprep.subr.bf16.mxu1 %v2245_v42  ;;  %1964 = vmatprep.subr.bf16.mxu0 %v2246_v43 }
 0x17d   :  { %1650 = vmatpush1.bf16.msra.mxu1 %v2243_v44  ;;  %1965 = vmatpush3.bf16.msra.mxu0 %v2247_v45 }
 0x17e   :  { %1651 = vmatprep.subr.bf16.mxu1 %v2250_v46  ;;  %1966 = vmatprep.subr.bf16.mxu0 %v2251_v47 }
 0x181   :  { %1652 = vmatpush1.bf16.msra.mxu1 %v2248_v48  ;;  %1967 = vmatpush3.bf16.msra.mxu0 %v2252_v49 }
 0x182   :  { %1653 = vmatprep.subr.bf16.mxu1 %v2255_v50  ;;  %1968 = vmatprep.subr.bf16.mxu0 %v2256_v51 }
 0x185   :  { %1654 = vmatpush1.bf16.msra.mxu1 %v2253_v52  ;;  %1969 = vmatpush3.bf16.msra.mxu0 %v2257_v53 }
 0x186   :  { %1655 = vmatprep.subr.bf16.mxu1 %v2260_v54  ;;  %1970 = vmatprep.subr.bf16.mxu0 %v2261_v55 }
 0x189   :  { %1656 = vmatpush1.bf16.msra.mxu1 %v2258_v56  ;;  %1971 = vmatpush3.bf16.msra.mxu0 %v2262_v57 }
 0x18a   :  { %1657 = vmatprep.subr.bf16.mxu1 %v2265_v58 }
 0x18c   :  { %1715 = vmatmul.mubr.bf16.vlgmr.msra.gmra.mxu0 %v2880_v29 }
 0x18d   :  { %1658 = vmatpush2.bf16.msra.mxu1 %v2263_v59 }
 0x18e   :  { %1659 = vmatprep.subr.bf16.mxu1 %v2268_v60 }
 0x191   :  { %1660 = vmatpush2.bf16.msra.mxu1 %v2266_v61 }
 0x192   :  { %1661 = vmatprep.subr.bf16.mxu1 %v2271_v62 }
 0x195   :  { %1662 = vmatpush2.bf16.msra.mxu1 %v2269_v63 }
 0x196   :  { %1663 = vmatprep.subr.bf16.mxu1 %v2274_v2 }
 0x199   :  { %1664 = vmatpush2.bf16.msra.mxu1 %v2272_v4 }
 0x19a   :  { %1665 = vmatprep.subr.bf16.mxu1 %v2277_v5 }
 0x19d   :  { %1666 = vmatpush2.bf16.msra.mxu1 %v2275_v6 }
 0x19e   :  { %1667 = vmatprep.subr.bf16.mxu1 %v2280_v7 }
 0x1a1   :  { %1668 = vmatpush2.bf16.msra.mxu1 %v2278_v8 }
 0x1a2   :  { %1669 = vmatprep.subr.bf16.mxu1 %v2283_v9 }
 0x1a5   :  { %1670 = vmatpush2.bf16.msra.mxu1 %v2281_v10 }
 0x1a6   :  { %1671 = vmatprep.subr.bf16.mxu1 %v2286_v11 }
 0x1a9   :  { %1672 = vmatpush2.bf16.msra.mxu1 %v2284_v12 }
 0x1ac   :  { %1674 = vmatmul.mubr.bf16.vlgmr.msra.gmra.mxu1 %v2880_v29 }
 0x22c   :  { %v1593_v20 = vpop.f32.mrf.mxu1  ;;  %v1634_v21 = vpop.f32.mrf.mxu0 }
 0x22d   :  { %v1594_v22 = vadd.f32 %v1593_v20, %v951_v16  ;;  %v1635_v23 = vadd.f32 %v1634_v21, %v959_v17 }
 0x22e   :  { %v1595_v24 = vpop.f32.mrf.mxu1  ;;  %v1636_v25 = vpop.f32.mrf.mxu0 }
 0x22f   :  { %1722 = vst [vmem:[#allocation2] sm:$0xff] %v1594_v22  ;;  %1724 = vst [vmem:[#allocation2 + $0x10] sm:$0xff] %v1635_v23  ;;  %v1596_v26 = vadd.f32 %v1595_v24, %v955_v18  ;;  %v1637_v27 = vadd.f32 %v1636_v25, %v963_v19 }
 0x230   :  { %v1597_v28 = vpop.f32.mrf.mxu1  ;;  %v1638_v29 = vpop.f32.mrf.mxu0 }
 0x231   :  { %1723 = vst [vmem:[#allocation2 + $0x8] sm:$0xff] %v1596_v26  ;;  %1725 = vst [vmem:[#allocation2 + $0x18] sm:$0xff] %v1637_v27 }
 0x232   :  { %v1598_v1 = vpop.f32.mrf.mxu1  ;;  %v1639_v30 = vpop.f32.mrf.mxu0 }
 0x24c   :  { %v1972_v3 = vpop.f32.mrf.mxu0 }
 0x24e   :  { %v1973_v33 = vpop.f32.mrf.mxu0 }
 0x24f   :  { %v1974_v34 = vadd.f32 %v1973_v33, %v1972_v3 }
 0x250   :  { %v1975_v35 = vpop.f32.mrf.mxu0 }
 0x251   :  { %v1717_v36 = vadd.f32 %v1974_v34, %v975_v32 }
 0x252   :  { %v1976_v37 = vpop.f32.mrf.mxu0 }
 0x253   :  { %1728 = vst.msk [vmem:[#allocation2 + $0x30] sm:$0xff] %vm636_vm0, %v1717_v36 }
 0x26c   :  { %v1675_v42 = vpop.f32.mrf.mxu1 }
 0x26d   :  { %v1676_v43 = vadd.f32 %v1675_v42, %v967_v40 }
 0x26e   :  { %v1677_v44 = vpop.f32.mrf.mxu1 }
 0x26f   :  { %1726 = vst [vmem:[#allocation2 + $0x20] sm:$0xff] %v1676_v43  ;;  %v1678_v45 = vadd.f32 %v1677_v44, %v971_v41 }
 0x270   :  { %v1679_v46 = vpop.f32.mrf.mxu1 }
 0x271   :  { %1727 = vst [vmem:[#allocation2 + $0x28] sm:$0xff] %v1678_v45 }
 0x272   :  { %v1680_v47 = vpop.f32.mrf.mxu1 }
 0x273   :  { %2306 = shalt.err (!%p2303_p4)
}
 0x274   :  { %1738 = dma.vmem_to_hbm [thread:$0]  %s1736_s4, 896, %s3039_s5, [#allocation3]  }
 0x275   :  { %2315 = dma.done.wait [#allocation3], 896  }
 0x276   :  { %2316 = vsyncadd [#allocation3], 4294966400 }
 0x277   :  { %1742 = vsyncpa [#allocation3], 1 }

</bundles_post_ra>
